<compile_context>
chip_gen: v7x
topology: tpu7x:2x2x1
jax: 0.10.0
libtpu: 0.0.40
codegen_flags: <defaults>
</compile_context>

<pallas_src>
import functools

import jax
import jax.numpy as jnp
from jax import lax
from jax.experimental import pallas as pl
from jax.experimental.pallas import tpu as pltpu

_EPS = 1e-12   # matches torch.nn.functional.normalize default eps
_LANE = 128
_SUBLANE = 8


def _round_up(x, m):
    return ((x + m - 1) // m) * m


def _cosine_gather_kernel(xi_ref, yi_ref, tab_ref, out_ref, *, vx_pad):
    """Fused embedding gather + row-wise cosine for one tile of rows.

    xi_ref, yi_ref : (1, TN) int32   flattened lookup indices for this tile
    tab_ref        : (2*Ep, Vtot) bf16 block-diagonal [x_tab.T | 0 ; 0 | y_tab.T]
    out_ref        : (1, TN) f32     per-row cosine similarity (lane dense)
    """
    xi = xi_ref[...]                               # (1, TN)
    yi = yi_ref[...] + vx_pad                      # shift into the y block
    tab = tab_ref[...]                             # (2*Ep, Vtot) bf16
    two_ep, vtot = tab.shape
    ep = two_ep // 2
    tn = xi.shape[1]

    # Single shared iota; combined one-hot has exactly one 1 in the x block
    # (rows < vx_pad) and one 1 in the y block (rows >= vx_pad) per column.
    iota = lax.broadcasted_iota(jnp.int32, (vtot, tn), 0)
    oh = jnp.logical_or(iota == xi, iota == yi).astype(jnp.bfloat16)

    # One fused block-diagonal gather matmul: (2Ep, Vtot) @ (Vtot, TN).
    # bf16 x bf16 -> f32 accumulation: exact selection of the bf16 table rows.
    g = jnp.dot(tab, oh, preferred_element_type=jnp.float32)   # (2Ep, TN) f32
    xe = g[:ep]                                                 # (Ep, TN)
    ye = g[ep:]                                                 # (Ep, TN)

    # cosine = <x,y> / (max(||x||, eps) * max(||y||, eps)), via rsqrt of the
    # eps^2-clamped squared norms (== torch's max(||.||, eps) semantics).
    dot = jnp.sum(xe * ye, axis=0, keepdims=True)               # (1, TN)
    nx2 = jnp.sum(xe * xe, axis=0, keepdims=True)
    ny2 = jnp.sum(ye * ye, axis=0, keepdims=True)
    eps2 = jnp.float32(_EPS * _EPS)
    out_ref[...] = (dot
                    * lax.rsqrt(jnp.maximum(nx2, eps2))
                    * lax.rsqrt(jnp.maximum(ny2, eps2)))


def cosine_lookup_pallas(x_idx, y_idx, tab, vx_pad, *, tile_n=1024):
    """Fused lookup + cosine.

    x_idx, y_idx : int index arrays (any shape, same number of elements N)
    tab          : (2*Ep, Vtot) bf16 block-diagonal kernel-layout table
    vx_pad       : lane-padded x vocabulary size (static offset for y indices)
    returns      : (N,) float32 per-row cosine similarity
    """
    n = int(x_idx.size)
    two_ep, vtot = tab.shape

    # Row-tile size: multiple of 128 lanes, >=2 tiles when possible so the
    # "parallel" grid axis can feed both v7x TensorCores.
    n128 = _round_up(max(n, 1), _LANE)
    tn = min(tile_n, n128)
    if n128 >= 2 * _LANE:
        tn = min(tn, _round_up((n128 + 1) // 2, _LANE))
    tn = max(_LANE, _round_up(tn, _LANE))
    n_pad = _round_up(n, tn)

    # jnp.pad (no zeros+scatter HBM materialize); padded tail selects row 0 of
    # each table, result is trimmed below.
    pad = ((0, 0), (0, n_pad - n))
    xi = jnp.pad(jnp.asarray(x_idx, jnp.int32).reshape(1, -1), pad)
    yi = jnp.pad(jnp.asarray(y_idx, jnp.int32).reshape(1, -1), pad)

    grid = (n_pad // tn,)
    cost = pl.CostEstimate(
        flops=2 * two_ep * vtot * n_pad + 6 * (two_ep // 2) * n_pad,
        transcendentals=2 * n_pad,
        bytes_accessed=12 * n_pad + tab.size * tab.dtype.itemsize,
    )

    kernel = functools.partial(_cosine_gather_kernel, vx_pad=vx_pad)
    out = pl.pallas_call(
        kernel,
        out_shape=jax.ShapeDtypeStruct((1, n_pad), jnp.float32),
        grid=grid,
        in_specs=[
            pl.BlockSpec((1, tn), lambda i: (0, i)),        # x indices (tiled)
            pl.BlockSpec((1, tn), lambda i: (0, i)),        # y indices (tiled)
            pl.BlockSpec((two_ep, vtot), lambda i: (0, 0)),  # table, VMEM-resident
        ],
        out_specs=pl.BlockSpec((1, tn), lambda i: (0, i)),
        compiler_params=pltpu.CompilerParams(
            dimension_semantics=("parallel",)),
        cost_estimate=cost,
    )(xi, yi, tab)
    return out.reshape(-1)[:n]


class PallasModel:
    """JAX/Pallas port of TorchModel(n_x, n_y, n_e)."""

    def __init__(self, n_x, n_y, n_e, key, table_dtype=jnp.bfloat16):
        self.n_x, self.n_y, self.n_e = n_x, n_y, n_e
        kx, ky = jax.random.split(key)
        # torch.nn.Embedding default init: N(0, 1). Tables stored in bf16
        # (native MXU operand dtype); all post-matmul arithmetic is f32.
        self.x_e = jax.random.normal(kx, (n_x, n_e), jnp.float32).astype(table_dtype)
        self.y_e = jax.random.normal(ky, (n_y, n_e), jnp.float32).astype(table_dtype)
        # Kernel-friendly layout: single block-diagonal transposed table
        #   rows [0, Ep)      cols [0, Vx_pad)          = x_e.T
        #   rows [Ep, 2Ep)    cols [Vx_pad, Vx_pad+Vy_pad) = y_e.T
        # Padded rows/columns are zero and never selected / contribute 0.
        self.tab, self.vx_pad = self._to_kernel_layout(self.x_e, self.y_e)

    @staticmethod
    def _to_kernel_layout(x_tab, y_tab):
        vx, e = x_tab.shape
        vy, _ = y_tab.shape
        ep = _round_up(e, _SUBLANE)
        vxp = _round_up(vx, _LANE)
        vyp = _round_up(vy, _LANE)
        tab = jnp.zeros((2 * ep, vxp + vyp), x_tab.dtype)
        tab = tab.at[:e, :vx].set(x_tab.T)
        tab = tab.at[ep:ep + e, vxp:vxp + vy].set(y_tab.T)
        return tab, vxp

    def __call__(self, x, y):
        # Flatten indices row-major like torch's .view(-1, ...); gather is
        # fused into the Pallas kernel (no jnp.take materialization in HBM).
        return cosine_lookup_pallas(x, y, self.tab, self.vx_pad)


def _reference(model, x, y):
    xt = model.x_e.astype(jnp.float32)
    yt = model.y_e.astype(jnp.float32)
    xe = jnp.take(xt, x.reshape(-1), axis=0)
    ye = jnp.take(yt, y.reshape(-1), axis=0)
    xh = xe / jnp.maximum(jnp.linalg.norm(xe, axis=-1, keepdims=True), _EPS)
    yh = ye / jnp.maximum(jnp.linalg.norm(ye, axis=-1, keepdims=True), _EPS)
    return jnp.sum(xh * yh, axis=-1)


if __name__ == "__main__":
    key = jax.random.PRNGKey(0)
    k_param, k_x, k_y = jax.random.split(key, 3)

    n_x, n_y, n_e = 16, 20, 32           # small vocab sizes, hidden = 32
    batch, seq = 2, 8                    # index tensors (2, 8) -> N = 16 rows

    model = PallasModel(n_x, n_y, n_e, k_param)

    x_idx = jax.random.randint(k_x, (batch, seq), 0, n_x, dtype=jnp.int32)
    y_idx = jax.random.randint(k_y, (batch, seq), 0, n_y, dtype=jnp.int32)

    out = jax.block_until_ready(model(x_idx, y_idx))

    ref = _reference(model, x_idx, y_idx)
    assert out.shape == (batch * seq,), out.shape
    assert jnp.allclose(out, ref, atol=1e-5, rtol=1e-5), (out, ref)

    print("KERNEL_OK")
</pallas_src>

<mosaic_0001>
module attributes {stable_mosaic.version = 11 : i64} {
  func.func @_cosine_gather_kernel(%arg0: i32, %arg1: memref<1x128xi32, #tpu.memory_space<vmem>>, %arg2: memref<1x128xi32, #tpu.memory_space<vmem>>, %arg3: memref<64x256xbf16, #tpu.memory_space<vmem>>, %arg4: memref<1x128xf32, #tpu.memory_space<vmem>>) attributes {dimension_semantics = [#tpu.dimension_semantics<parallel>], iteration_bounds = array<i64: 1>, scalar_prefetch = 0 : i64, scratch_operands = 0 : i64, tpu.core_type = #tpu.core_type<tc>, window_params = [{transform_indices = @transform_0, window_bounds = array<i64: 1, 128>}, {transform_indices = @transform_1, window_bounds = array<i64: 1, 128>}, {pipeline_mode = #tpu.pipeline_mode<synchronous>, transform_indices = @transform_2, window_bounds = array<i64: 64, 256>}, {transform_indices = @transform_3, window_bounds = array<i64: 1, 128>}]} {
    %c0 = arith.constant 0 : index
    %c0_0 = arith.constant 0 : index
    %0 = vector.load %arg1[%c0, %c0_0] : memref<1x128xi32, #tpu.memory_space<vmem>>, vector<1x128xi32>
    %c0_1 = arith.constant 0 : index
    %c0_2 = arith.constant 0 : index
    %1 = vector.load %arg2[%c0_1, %c0_2] : memref<1x128xi32, #tpu.memory_space<vmem>>, vector<1x128xi32>
    %c128_i32 = arith.constant 128 : i32
    %2 = vector.broadcast %c128_i32 : i32 to vector<1x128xi32>
    %3 = arith.addi %1, %2 : vector<1x128xi32>
    %c0_3 = arith.constant 0 : index
    %c0_4 = arith.constant 0 : index
    %4 = vector.load %arg3[%c0_3, %c0_4] : memref<64x256xbf16, #tpu.memory_space<vmem>>, vector<64x256xbf16>
    %5 = tpu.iota {dimensions = array<i32: 0>} : vector<256x128xi32>
    %6 = vector.broadcast %0 : vector<1x128xi32> to vector<256x128xi32>
    %7 = arith.cmpi eq, %5, %6 : vector<256x128xi32>
    %8 = vector.broadcast %3 : vector<1x128xi32> to vector<256x128xi32>
    %9 = arith.cmpi eq, %5, %8 : vector<256x128xi32>
    %10 = arith.ori %7, %9 : vector<256x128xi1>
    %11 = arith.extui %10 : vector<256x128xi1> to vector<256x128xi32>
    %12 = arith.sitofp %11 : vector<256x128xi32> to vector<256x128xf32>
    %13 = arith.truncf %12 : vector<256x128xf32> to vector<256x128xbf16>
    %cst = arith.constant dense<0.000000e+00> : vector<64x128xf32>
    %14 = tpu.matmul %4, %13, %cst {dimension_numbers = #tpu.dot_dimension_numbers<[1], [0], [0], [1], [0, 0, 1, 1], [], []>} : vector<64x256xbf16>, vector<256x128xbf16>, vector<64x128xf32> -> vector<64x128xf32>
    %15 = vector.extract_strided_slice %14 {offsets = [0, 0], sizes = [32, 128], strides = [1, 1]} : vector<64x128xf32> to vector<32x128xf32>
    %16 = vector.extract_strided_slice %14 {offsets = [32, 0], sizes = [32, 128], strides = [1, 1]} : vector<64x128xf32> to vector<32x128xf32>
    %17 = arith.mulf %15, %16 : vector<32x128xf32>
    %cst_5 = arith.constant dense<0.000000e+00> : vector<128xf32>
    %18 = vector.multi_reduction <add>, %17, %cst_5 [0] : vector<32x128xf32> to vector<128xf32>
    %19 = vector.shape_cast %18 : vector<128xf32> to vector<1x128xf32>
    %20 = arith.mulf %15, %15 : vector<32x128xf32>
    %cst_6 = arith.constant dense<0.000000e+00> : vector<128xf32>
    %21 = vector.multi_reduction <add>, %20, %cst_6 [0] : vector<32x128xf32> to vector<128xf32>
    %22 = vector.shape_cast %21 : vector<128xf32> to vector<1x128xf32>
    %23 = arith.mulf %16, %16 : vector<32x128xf32>
    %cst_7 = arith.constant dense<0.000000e+00> : vector<128xf32>
    %24 = vector.multi_reduction <add>, %23, %cst_7 [0] : vector<32x128xf32> to vector<128xf32>
    %25 = vector.shape_cast %24 : vector<128xf32> to vector<1x128xf32>
    %cst_8 = arith.constant 1.000000e-24 : f32
    %26 = vector.broadcast %cst_8 : f32 to vector<1x128xf32>
    %27 = arith.maximumf %22, %26 : vector<1x128xf32>
    %28 = math.rsqrt %27 : vector<1x128xf32>
    %29 = arith.mulf %19, %28 : vector<1x128xf32>
    %cst_9 = arith.constant 1.000000e-24 : f32
    %30 = vector.broadcast %cst_9 : f32 to vector<1x128xf32>
    %31 = arith.maximumf %25, %30 : vector<1x128xf32>
    %32 = math.rsqrt %31 : vector<1x128xf32>
    %33 = arith.mulf %29, %32 : vector<1x128xf32>
    %c0_10 = arith.constant 0 : index
    %c0_11 = arith.constant 0 : index
    %34 = vector.load %arg4[%c0_10, %c0_11] : memref<1x128xf32, #tpu.memory_space<vmem>>, vector<1x128xf32>
    tpu.vector_store %arg4[%c0_10, %c0_11], %33 {strides = array<i32>} : memref<1x128xf32, #tpu.memory_space<vmem>>, vector<1x128xf32>,
    return
  }
  func.func @transform_0(%arg0: i32) -> (i32, i32) {
    %c0_i32 = arith.constant 0 : i32
    %c0_i32_0 = arith.constant 0 : i32
    return %c0_i32, %arg0 : i32, i32
  }
  func.func @transform_1(%arg0: i32) -> (i32, i32) {
    %c0_i32 = arith.constant 0 : i32
    %c0_i32_0 = arith.constant 0 : i32
    return %c0_i32, %arg0 : i32, i32
  }
  func.func @transform_2(%arg0: i32) -> (i32, i32) {
    %c0_i32 = arith.constant 0 : i32
    %c0_i32_0 = arith.constant 0 : i32
    %c0_i32_1 = arith.constant 0 : i32
    return %c0_i32, %c0_i32_0 : i32, i32
  }
  func.func @transform_3(%arg0: i32) -> (i32, i32) {
    %c0_i32 = arith.constant 0 : i32
    %c0_i32_0 = arith.constant 0 : i32
    return %c0_i32, %arg0 : i32, i32
  }
}

</mosaic_0001>

<bundles_post_ra>
// kernel: tpu_custom_call.1
= control target key start
LH: loop header
LB: loop body
LE: loop exit
PB: predicated region body
PF: predicated region fallthrough
CT: control target
= control target key end

     0   :  { %8 = vsyncpa [#allocation3], 0  ;;  %s868_s0 = inlined_call_operand.hbm [shape: s32[1,128], index: 0, kind: input, shape index: {}]   ;;  %s869_s1 = inlined_call_operand.vmem [shape: s32[1,128], index: 1, kind: input, shape index: {}]   ;;  %s870_s2 = inlined_call_operand.hbm [shape: bf16[64,256], index: 2, kind: input, shape index: {}]   ;;  %s871_s3 = inlined_call_operand.hbm [shape: f32[1,128], index: 3, kind: output, shape index: {}]  }
   0x1   :  { %9 = vsyncpa [#allocation6], 0 }
   0x2   :  { %10 = vsyncpa [#allocation4], 0  ;;  %s660_s12 = smov [#allocation2]   ;;  %s661_s14 = smov [#allocation5]  }
   0x3   :  { %s17_s13 = sshll.u32 %s660_s12, 4  ;;  %s28_s15 = sshll.u32 %s661_s14, 4  ;;  %s18_s13 = int_to_ptr.vmem [resolvable:$true] %s17_s13  ;;  %s686_s15 = int_to_ptr.vmem [resolvable:$true] %s28_s15 }
   0x4   :  { %s588_s18 = scalar_lea.hbm %s868_s0, 16 }
   0x5   :  { %p589_p0 = scmp.ne.s32.totalorder %s868_s0, %s588_s18  ;;  %p592_p1 = scmp.lt.u32.totalorder %s588_s18, %s868_s0 }
   0x7   :  { %p594_p2 = pnand %p592_p1, %p589_p0 }
   0x9   :  { %597 = shalt.err (!%p594_p2)
}
   0xa   :  { %s598_s23 = scalar_lea.vmem %s18_s13, 16  ;;  %s602_s24 = scalar_lea.vmem %s18_s13, 32 }
   0xb   :  { %p599_p3 = scmp.ne.s32.totalorder %s18_s13, %s598_s23  ;;  %p603_p4 = scmp.lt.s32.totalorder %s18_s13, %s18_s13 }
   0xc   :  { %p604_p5 = scmp.lt.s32.totalorder %s602_s24, %s598_s23 }
   0xe   :  { %p605_p6 = por %p604_p5, %p603_p4 }
  0x10   :  { %p606_p7 = pnand %p605_p6, %p599_p3 }
  0x12   :  { %609 = shalt.err (!%p606_p7)
}
  0x13   :  { %20 = dma.hbm_to_vmem [thread:$0]  %s868_s0, 16, %s18_s13, [#allocation3]  }
  0x14   :  { %s610_s29 = scalar_lea.hbm %s870_s2, 1024 }
  0x15   :  { %p611_p8 = scmp.ne.s32.totalorder %s870_s2, %s610_s29  ;;  %p614_p9 = scmp.lt.u32.totalorder %s610_s29, %s870_s2 }
  0x17   :  { %p616_p10 = pnand %p614_p9, %p611_p8 }
  0x19   :  { %619 = shalt.err (!%p616_p10)
}
  0x1a   :  { %s620_s7 = scalar_lea.vmem %s686_s15, 1024  ;;  %p625_p12 = scmp.lt.s32.totalorder %s686_s15, %s686_s15 }
  0x1b   :  { %p621_p11 = scmp.ne.s32.totalorder %s686_s15, %s620_s7  ;;  %p626_p13 = scmp.lt.s32.totalorder %s620_s7, %s620_s7 }
  0x1d   :  { %p627_p0 = por %p626_p13, %p625_p12 }
  0x1f   :  { %p628_p1 = pnand %p627_p0, %p621_p11 }
  0x21   :  { %631 = shalt.err (!%p628_p1)
}
  0x22   :  { %s662_s0 = smov 128   ;;  %s663_s8 = smov 8  }
  0x23   :  { %34 = dma.hbm_to_vmem [thread:$0]  %s870_s2, 1024, %s686_s15, [#allocation6], %s662_s0, %s662_s0, %s663_s8  }
  0x24   :  { %654 = dma.done.wait [#allocation3], 16  }
  0x25   :  { %655 = vsyncadd [#allocation3], 4294967280 }
  0x26   :  { %656 = dma.done.wait [#allocation6], 1024  }
  0x27   :  { %657 = vsyncadd [#allocation6], 4294966272  ;;  %v53_v0 = vlaneseq  ;;  %v721_v4 = vld [vmem:[#allocation2] ss:$0 sm:$0xff]  ;;  %v574_v8 = vld [vmem:[#allocation5 + $0x4] ss:$8 sps:$4 sm:$0xff]  }
  0x28   :  { %v43_v5 = vld [vmem:[%s869_s1] sm:$0x1]  ;;  %v577_v11 = vld [vmem:[#allocation5 + $0x24] ss:$8 sps:$4 sm:$0xff]   ;;  %342 = vmatprep.mubr.bf16.mxu0 %v574_v8  ;;  %v664_v15 = vmov 1.0|1.0  }
  0x29   :  { %v717_v1 = vshrl.u32 %v53_v0, 7  ;;  %v44_v7 = vadd.s32 128, %v43_v5  ;;  %358 = vmatprep.mubr.bf16.mxu1 %v577_v11  ;;  %v572_v41 = vld [vmem:[#allocation5] ss:$8 sps:$4 sm:$0xff]   ;;  %v578_v43 = vld [vmem:[#allocation5 + $0x14] ss:$8 sps:$4 sm:$0xff]  }
  0x2a   :  { %v575_v42 = vld [vmem:[#allocation5 + $0x20] ss:$8 sps:$4 sm:$0xff]   ;;  %v580_v44 = vld [vmem:[#allocation5 + $0x34] ss:$8 sps:$4 sm:$0xff]   ;;  %v582_v45 = vld [vmem:[#allocation5 + $0x10] ss:$8 sps:$4 sm:$0xff]  }
  0x2b   :  { %v124_v2 = vsub.s32 0, %v717_v1  ;;  %v70_v3 = vadd.s32 128, %v717_v1  ;;  %v71_v6 = vadd.s32 136, %v717_v1  ;;  %v55_v10 = vadd.s32 8, %v717_v1  ;;  %v583_v46 = vld [vmem:[#allocation5 + $0x30] ss:$8 sps:$4 sm:$0xff]  }
  0x2c   :  { %v72_v12 = vadd.s32 144, %v717_v1  ;;  %vm90_vm5 = vcmp.eq.s32.totalorder %v717_v1, %v721_v4  ;;  %v73_v13 = vadd.s32 152, %v717_v1  ;;  %v56_v14 = vadd.s32 16, %v717_v1  ;;  %s665_s1 = smov [#allocation7]  }
  0x2d   :  { %v727_v9 = vrot.slane %v44_v7, %v124_v2  ;;  %vm106_vm0 = vcmp.eq.s32.totalorder %v70_v3, %v721_v4  ;;  %vm107_vm1 = vcmp.eq.s32.totalorder %v71_v6, %v721_v4  ;;  %vm91_vm8 = vcmp.eq.s32.totalorder %v55_v10, %v721_v4  ;;  %s427_s2 = sshll.u32 %s665_s1, 4  ;;  %s428_s2 = int_to_ptr.vmem [resolvable:$true] %s427_s2 }
  0x2e   :  { %vm108_vm12 = vcmp.eq.s32.totalorder %v72_v12, %v721_v4  ;;  %v57_v16 = vadd.s32 24, %v717_v1  ;;  %vm109_vm15 = vcmp.eq.s32.totalorder %v73_v13, %v721_v4  ;;  %v74_v17 = vadd.s32 160, %v717_v1  ;;  %s632_s13 = scalar_lea.vmem %s428_s2, 16  ;;  %s636_s14 = scalar_lea.vmem %s428_s2, 32 }
  0x2f   :  { %vm142_vm2 = vcmp.eq.s32.totalorder %v70_v3, %v727_v9  ;;  %vm143_vm3 = vcmp.eq.s32.totalorder %v71_v6, %v727_v9  ;;  %vm126_vm6 = vcmp.eq.s32.totalorder %v717_v1, %v727_v9  ;;  %vm127_vm9 = vcmp.eq.s32.totalorder %v55_v10, %v727_v9  ;;  %p633_p2 = scmp.ne.s32.totalorder %s428_s2, %s632_s13  ;;  %p637_p3 = scmp.lt.s32.totalorder %s428_s2, %s428_s2 }
  0x30   :  { %vm174_vm4 = vmor %vm106_vm0, %vm142_vm2  ;;  %vm144_vm13 = vcmp.eq.s32.totalorder %v72_v12, %v727_v9  ;;  %vm145_vm0 = vcmp.eq.s32.totalorder %v73_v13, %v727_v9  ;;  %v75_v18 = vadd.s32 168, %v717_v1  ;;  %v58_v19 = vadd.s32 32, %v717_v1  ;;  %p638_p4 = scmp.lt.s32.totalorder %s636_s14, %s632_s13 }
  0x31   :  { %vm175_vm7 = vmor %vm107_vm1, %vm143_vm3  ;;  %vm92_vm3 = vcmp.eq.s32.totalorder %v56_v14, %v721_v4  ;;  %v59_v20 = vadd.s32 40, %v717_v1  ;;  %v76_v21 = vadd.s32 176, %v717_v1  ;;  %v77_v22 = vadd.s32 184, %v717_v1 }
  0x32   :  { %vm494_vm10 = vmpackc.low %vm175_vm7, %vm174_vm4  ;;  %vm128_vm4 = vcmp.eq.s32.totalorder %v56_v14, %v727_v9  ;;  %vm129_vm7 = vcmp.eq.s32.totalorder %v57_v16, %v727_v9  ;;  %v60_v23 = vadd.s32 48, %v717_v1  ;;  %v61_v24 = vadd.s32 56, %v717_v1  ;;  %p639_p5 = por %p638_p4, %p637_p3 }
  0x33   :  { %510 = vmatprep.subr.msk.bf16.mxu0 %vm494_vm10, %v664_v15  ;;  %550 = vmatprep.subr.msk.bf16.mxu1 %vm494_vm10, %v664_v15  ;;  %vm158_vm11 = vmor %vm90_vm5, %vm126_vm6  ;;  %vm93_vm6 = vcmp.eq.s32.totalorder %v57_v16, %v721_v4  ;;  %vm110_vm10 = vcmp.eq.s32.totalorder %v74_v17, %v721_v4  ;;  %v78_v25 = vadd.s32 192, %v717_v1  ;;  %v79_v26 = vadd.s32 200, %v717_v1 }
  0x34   :  { %vm159_vm14 = vmor %vm91_vm8, %vm127_vm9  ;;  %v62_v27 = vadd.s32 64, %v717_v1  ;;  %v63_v28 = vadd.s32 72, %v717_v1  ;;  %v80_v29 = vadd.s32 208, %v717_v1  ;;  %v81_v30 = vadd.s32 216, %v717_v1  ;;  %p640_p6 = pnand %p639_p5, %p633_p2 }
  0x35   :  { %vm478_vm1 = vmpackc.low %vm159_vm14, %vm158_vm11  ;;  %vm146_vm11 = vcmp.eq.s32.totalorder %v74_v17, %v727_v9  ;;  %vm147_vm14 = vcmp.eq.s32.totalorder %v75_v18, %v727_v9  ;;  %v64_v31 = vadd.s32 80, %v717_v1  ;;  %v65_v32 = vadd.s32 88, %v717_v1 }
  0x36   :  { %511 = vmatpush3.bf16.msk.msra.mxu0 %vm478_vm1, %v664_v15  ;;  %558 = vmatpush3.bf16.msk.msra.mxu1 %vm478_vm1, %v664_v15  ;;  %vm176_vm2 = vmor %vm108_vm12, %vm144_vm13  ;;  %vm111_vm13 = vcmp.eq.s32.totalorder %v75_v18, %v721_v4  ;;  %vm94_vm1 = vcmp.eq.s32.totalorder %v58_v19, %v721_v4  ;;  %v82_v33 = vadd.s32 224, %v717_v1  ;;  %v83_v34 = vadd.s32 232, %v717_v1 }
  0x37   :  { %vm177_vm5 = vmor %vm109_vm15, %vm145_vm0  ;;  %v66_v35 = vadd.s32 96, %v717_v1  ;;  %v67_v36 = vadd.s32 104, %v717_v1  ;;  %v84_v37 = vadd.s32 240, %v717_v1  ;;  %v85_v38 = vadd.s32 248, %v717_v1 }
  0x38   :  { %vm496_vm8 = vmpackc.low %vm177_vm5, %vm176_vm2  ;;  %vm130_vm2 = vcmp.eq.s32.totalorder %v58_v19, %v727_v9  ;;  %vm131_vm5 = vcmp.eq.s32.totalorder %v59_v20, %v727_v9  ;;  %v68_v39 = vadd.s32 112, %v717_v1  ;;  %v69_v40 = vadd.s32 120, %v717_v1 }
  0x39   :  { %512 = vmatprep.subr.msk.bf16.mxu0 %vm496_vm8, %v664_v15  ;;  %551 = vmatprep.subr.msk.bf16.mxu1 %vm496_vm8, %v664_v15  ;;  %vm160_vm9 = vmor %vm92_vm3, %vm128_vm4  ;;  %vm95_vm4 = vcmp.eq.s32.totalorder %v59_v20, %v721_v4  ;;  %vm112_vm8 = vcmp.eq.s32.totalorder %v76_v21, %v721_v4 }
  0x3a   :  { %vm161_vm12 = vmor %vm93_vm6, %vm129_vm7 }
  0x3b   :  { %vm480_vm15 = vmpackc.low %vm161_vm12, %vm160_vm9  ;;  %vm148_vm9 = vcmp.eq.s32.totalorder %v76_v21, %v727_v9  ;;  %vm149_vm12 = vcmp.eq.s32.totalorder %v77_v22, %v727_v9 }
  0x3c   :  { %513 = vmatpush3.bf16.msk.msra.mxu0 %vm480_vm15, %v664_v15  ;;  %559 = vmatpush3.bf16.msk.msra.mxu1 %vm480_vm15, %v664_v15  ;;  %vm178_vm0 = vmor %vm110_vm10, %vm146_vm11  ;;  %vm113_vm11 = vcmp.eq.s32.totalorder %v77_v22, %v721_v4  ;;  %vm96_vm15 = vcmp.eq.s32.totalorder %v60_v23, %v721_v4 }
  0x3d   :  { %vm179_vm3 = vmor %vm111_vm13, %vm147_vm14 }
  0x3e   :  { %vm498_vm6 = vmpackc.low %vm179_vm3, %vm178_vm0  ;;  %vm132_vm0 = vcmp.eq.s32.totalorder %v60_v23, %v727_v9  ;;  %vm133_vm3 = vcmp.eq.s32.totalorder %v61_v24, %v727_v9 }
  0x3f   :  { %514 = vmatprep.subr.msk.bf16.mxu0 %vm498_vm6, %v664_v15  ;;  %552 = vmatprep.subr.msk.bf16.mxu1 %vm498_vm6, %v664_v15  ;;  %vm162_vm7 = vmor %vm94_vm1, %vm130_vm2  ;;  %vm97_vm2 = vcmp.eq.s32.totalorder %v61_v24, %v721_v4  ;;  %vm114_vm6 = vcmp.eq.s32.totalorder %v78_v25, %v721_v4 }
  0x40   :  { %vm163_vm10 = vmor %vm95_vm4, %vm131_vm5 }
  0x41   :  { %vm482_vm13 = vmpackc.low %vm163_vm10, %vm162_vm7  ;;  %vm150_vm7 = vcmp.eq.s32.totalorder %v78_v25, %v727_v9  ;;  %vm151_vm10 = vcmp.eq.s32.totalorder %v79_v26, %v727_v9 }
  0x42   :  { %515 = vmatpush3.bf16.msk.msra.mxu0 %vm482_vm13, %v664_v15  ;;  %560 = vmatpush3.bf16.msk.msra.mxu1 %vm482_vm13, %v664_v15  ;;  %vm180_vm14 = vmor %vm112_vm8, %vm148_vm9  ;;  %vm115_vm9 = vcmp.eq.s32.totalorder %v79_v26, %v721_v4  ;;  %vm98_vm13 = vcmp.eq.s32.totalorder %v62_v27, %v721_v4 }
  0x43   :  { %vm181_vm1 = vmor %vm113_vm11, %vm149_vm12 }
  0x44   :  { %vm500_vm4 = vmpackc.low %vm181_vm1, %vm180_vm14  ;;  %vm134_vm14 = vcmp.eq.s32.totalorder %v62_v27, %v727_v9  ;;  %vm135_vm1 = vcmp.eq.s32.totalorder %v63_v28, %v727_v9 }
  0x45   :  { %516 = vmatprep.subr.msk.bf16.mxu0 %vm500_vm4, %v664_v15  ;;  %553 = vmatprep.subr.msk.bf16.mxu1 %vm500_vm4, %v664_v15  ;;  %vm164_vm5 = vmor %vm96_vm15, %vm132_vm0  ;;  %vm99_vm0 = vcmp.eq.s32.totalorder %v63_v28, %v721_v4  ;;  %vm116_vm4 = vcmp.eq.s32.totalorder %v80_v29, %v721_v4 }
  0x46   :  { %vm165_vm8 = vmor %vm97_vm2, %vm133_vm3 }
  0x47   :  { %vm484_vm11 = vmpackc.low %vm165_vm8, %vm164_vm5  ;;  %vm152_vm5 = vcmp.eq.s32.totalorder %v80_v29, %v727_v9  ;;  %vm153_vm8 = vcmp.eq.s32.totalorder %v81_v30, %v727_v9 }
  0x48   :  { %517 = vmatpush3.bf16.msk.msra.mxu0 %vm484_vm11, %v664_v15  ;;  %561 = vmatpush3.bf16.msk.msra.mxu1 %vm484_vm11, %v664_v15  ;;  %vm182_vm12 = vmor %vm114_vm6, %vm150_vm7  ;;  %vm117_vm7 = vcmp.eq.s32.totalorder %v81_v30, %v721_v4  ;;  %vm100_vm11 = vcmp.eq.s32.totalorder %v64_v31, %v721_v4 }
  0x49   :  { %vm183_vm15 = vmor %vm115_vm9, %vm151_vm10 }
  0x4a   :  { %vm502_vm2 = vmpackc.low %vm183_vm15, %vm182_vm12  ;;  %vm136_vm12 = vcmp.eq.s32.totalorder %v64_v31, %v727_v9  ;;  %vm137_vm15 = vcmp.eq.s32.totalorder %v65_v32, %v727_v9 }
  0x4b   :  { %518 = vmatprep.subr.msk.bf16.mxu0 %vm502_vm2, %v664_v15  ;;  %554 = vmatprep.subr.msk.bf16.mxu1 %vm502_vm2, %v664_v15  ;;  %vm166_vm3 = vmor %vm98_vm13, %vm134_vm14  ;;  %vm101_vm14 = vcmp.eq.s32.totalorder %v65_v32, %v721_v4  ;;  %vm118_vm2 = vcmp.eq.s32.totalorder %v82_v33, %v721_v4 }
  0x4c   :  { %vm167_vm6 = vmor %vm99_vm0, %vm135_vm1 }
  0x4d   :  { %vm486_vm9 = vmpackc.low %vm167_vm6, %vm166_vm3  ;;  %vm154_vm3 = vcmp.eq.s32.totalorder %v82_v33, %v727_v9  ;;  %vm155_vm6 = vcmp.eq.s32.totalorder %v83_v34, %v727_v9 }
  0x4e   :  { %519 = vmatpush3.bf16.msk.msra.mxu0 %vm486_vm9, %v664_v15  ;;  %562 = vmatpush3.bf16.msk.msra.mxu1 %vm486_vm9, %v664_v15  ;;  %vm184_vm10 = vmor %vm116_vm4, %vm152_vm5  ;;  %vm119_vm5 = vcmp.eq.s32.totalorder %v83_v34, %v721_v4  ;;  %vm102_vm9 = vcmp.eq.s32.totalorder %v66_v35, %v721_v4 }
  0x4f   :  { %vm185_vm13 = vmor %vm117_vm7, %vm153_vm8 }
  0x50   :  { %vm504_vm0 = vmpackc.low %vm185_vm13, %vm184_vm10  ;;  %vm138_vm10 = vcmp.eq.s32.totalorder %v66_v35, %v727_v9  ;;  %vm139_vm13 = vcmp.eq.s32.totalorder %v67_v36, %v727_v9 }
  0x51   :  { %520 = vmatprep.subr.msk.bf16.mxu0 %vm504_vm0, %v664_v15  ;;  %555 = vmatprep.subr.msk.bf16.mxu1 %vm504_vm0, %v664_v15  ;;  %vm168_vm1 = vmor %vm100_vm11, %vm136_vm12  ;;  %vm103_vm12 = vcmp.eq.s32.totalorder %v67_v36, %v721_v4  ;;  %vm120_vm0 = vcmp.eq.s32.totalorder %v84_v37, %v721_v4 }
  0x52   :  { %vm169_vm4 = vmor %vm101_vm14, %vm137_vm15 }
  0x53   :  { %vm488_vm7 = vmpackc.low %vm169_vm4, %vm168_vm1  ;;  %vm156_vm1 = vcmp.eq.s32.totalorder %v84_v37, %v727_v9  ;;  %vm157_vm4 = vcmp.eq.s32.totalorder %v85_v38, %v727_v9 }
  0x54   :  { %521 = vmatpush3.bf16.msk.msra.mxu0 %vm488_vm7, %v664_v15  ;;  %563 = vmatpush3.bf16.msk.msra.mxu1 %vm488_vm7, %v664_v15  ;;  %vm186_vm8 = vmor %vm118_vm2, %vm154_vm3  ;;  %vm121_vm3 = vcmp.eq.s32.totalorder %v85_v38, %v721_v4  ;;  %vm104_vm7 = vcmp.eq.s32.totalorder %v68_v39, %v721_v4 }
  0x55   :  { %vm187_vm11 = vmor %vm119_vm5, %vm155_vm6 }
  0x56   :  { %vm506_vm14 = vmpackc.low %vm187_vm11, %vm186_vm8  ;;  %vm140_vm8 = vcmp.eq.s32.totalorder %v68_v39, %v727_v9  ;;  %vm141_vm11 = vcmp.eq.s32.totalorder %v69_v40, %v727_v9 }
  0x57   :  { %522 = vmatprep.subr.msk.bf16.mxu0 %vm506_vm14, %v664_v15  ;;  %556 = vmatprep.subr.msk.bf16.mxu1 %vm506_vm14, %v664_v15  ;;  %vm170_vm15 = vmor %vm102_vm9, %vm138_vm10  ;;  %vm105_vm10 = vcmp.eq.s32.totalorder %v69_v40, %v721_v4 }
  0x58   :  { %vm171_vm2 = vmor %vm103_vm12, %vm139_vm13 }
  0x59   :  { %vm490_vm5 = vmpackc.low %vm171_vm2, %vm170_vm15 }
  0x5a   :  { %523 = vmatpush3.bf16.msk.msra.mxu0 %vm490_vm5, %v664_v15  ;;  %564 = vmatpush3.bf16.msk.msra.mxu1 %vm490_vm5, %v664_v15  ;;  %vm188_vm6 = vmor %vm120_vm0, %vm156_vm1 }
  0x5b   :  { %vm189_vm9 = vmor %vm121_vm3, %vm157_vm4 }
  0x5c   :  { %vm508_vm12 = vmpackc.low %vm189_vm9, %vm188_vm6 }
  0x5d   :  { %524 = vmatprep.subr.msk.bf16.mxu0 %vm508_vm12, %v664_v15  ;;  %557 = vmatprep.subr.msk.bf16.mxu1 %vm508_vm12, %v664_v15  ;;  %vm172_vm13 = vmor %vm104_vm7, %vm140_vm8 }
  0x5e   :  { %vm173_vm14 = vmor %vm105_vm10, %vm141_vm11 }
  0x5f   :  { %vm492_vm15 = vmpackc.low %vm173_vm14, %vm172_vm13 }
  0x60   :  { %525 = vmatpush3.bf16.msk.msra.mxu0 %vm492_vm15, %v664_v15  ;;  %565 = vmatpush3.bf16.msk.msra.mxu1 %vm492_vm15, %v664_v15 }
  0x63   :  { %343 = vmatmul.mubr.bf16.vlgmr.msra.gmra.mrb[0].mxu0 %v572_v41  ;;  %359 = vmatmul.mubr.bf16.vlgmr.msra.gmra.mrb[0].mxu1 %v575_v42 }
  0x64   :  { %350 = vmatprep.mubr.bf16.mxu0 %v578_v43  ;;  %366 = vmatprep.mubr.bf16.mxu1 %v580_v44 }
  0x6b   :  { %351 = vmatmul.mubr.bf16.gmra.mrb[4].mxu0 %v582_v45  ;;  %367 = vmatmul.mubr.bf16.gmra.mrb[4].mxu1 %v583_v46 }
 0x136   :  { %v526_v47 = vpop.f32.mrb[0].mxu0  ;;  %v538_v48 = vpop.f32.mrb[0].mxu1 }
 0x137   :  { %v527_v49 = vpop.f32.mrb[1].mxu0  ;;  %v539_v50 = vpop.f32.mrb[1].mxu1 }
 0x138   :  { %v528_v51 = vadd.f32 %v527_v49, %v526_v47  ;;  %v540_v52 = vadd.f32 %v539_v50, %v538_v48  ;;  %v529_v53 = vpop.f32.mrb[2].mxu0  ;;  %v541_v54 = vpop.f32.mrb[2].mxu1 }
 0x139   :  { %v530_v55 = vpop.f32.mrb[3].mxu0  ;;  %v542_v56 = vpop.f32.mrb[3].mxu1 }
 0x13a   :  { %v375_v57 = vmul.f32 %v540_v52, %v528_v51  ;;  %v531_v58 = vadd.f32 %v530_v55, %v529_v53  ;;  %v401_v59 = vmul.f32 %v540_v52, %v540_v52  ;;  %v543_v60 = vadd.f32 %v542_v56, %v541_v54 }
 0x13b   :  { %v388_v61 = vmul.f32 %v528_v51, %v528_v51 }
 0x13c   :  { %v389_v62 = vmul.f32 %v531_v58, %v531_v58  ;;  %v376_v63 = vmul.f32 %v543_v60, %v531_v58  ;;  %v402_v0 = vmul.f32 %v543_v60, %v543_v60 }
 0x13e   :  { %v392_v1 = vadd.f32 %v389_v62, %v388_v61  ;;  %v532_v2 = vpop.f32.mrb[4].mxu0  ;;  %v544_v3 = vpop.f32.mrb[4].mxu1  ;;  %v379_v4 = vadd.f32 %v376_v63, %v375_v57  ;;  %v405_v5 = vadd.f32 %v402_v0, %v401_v59 }
 0x13f   :  { %v533_v6 = vpop.f32.mrb[5].mxu0  ;;  %v545_v7 = vpop.f32.mrb[5].mxu1 }
 0x140   :  { %v534_v8 = vadd.f32 %v533_v6, %v532_v2  ;;  %v546_v9 = vadd.f32 %v545_v7, %v544_v3  ;;  %v535_v10 = vpop.f32.mrb[6].mxu0  ;;  %v547_v11 = vpop.f32.mrb[6].mxu1 }
 0x141   :  { %v536_v12 = vpop.f32.mrb[7].mxu0  ;;  %v548_v13 = vpop.f32.mrb[7].mxu1 }
 0x142   :  { %v390_v14 = vmul.f32 %v534_v8, %v534_v8  ;;  %v377_v15 = vmul.f32 %v546_v9, %v534_v8  ;;  %v403_v16 = vmul.f32 %v546_v9, %v546_v9  ;;  %v537_v17 = vadd.f32 %v536_v12, %v535_v10 }
 0x143   :  { %v549_v18 = vadd.f32 %v548_v13, %v547_v11 }
 0x144   :  { %v393_v19 = vadd.f32 %v392_v1, %v390_v14  ;;  %v380_v20 = vadd.f32 %v379_v4, %v377_v15  ;;  %v406_v21 = vadd.f32 %v405_v5, %v403_v16  ;;  %v391_v22 = vmul.f32 %v537_v17, %v537_v17 }
 0x145   :  { %v378_v23 = vmul.f32 %v549_v18, %v537_v17  ;;  %v404_v24 = vmul.f32 %v549_v18, %v549_v18 }
 0x146   :  { %v394_v25 = vadd.f32 %v393_v19, %v391_v22 }
 0x147   :  { %v381_v26 = vadd.f32 %v380_v20, %v378_v23  ;;  %v407_v27 = vadd.f32 %v406_v21, %v404_v24 }
 0x148   :  { %v395_v28 = vrot.slane %v394_v25, 4 }
 0x149   :  { %v408_v29 = vrot.slane %v407_v27, 4  ;;  %v382_v31 = vrot.slane %v381_v26, 4 }
 0x14a   :  { %v396_v30 = vadd.f32 %v395_v28, %v394_v25 }
 0x14b   :  { %v409_v32 = vadd.f32 %v408_v29, %v407_v27  ;;  %v383_v36 = vadd.f32 %v382_v31, %v381_v26 }
 0x14c   :  { %v397_v33 = vrot.slane %v396_v30, 2 }
 0x14d   :  { %v410_v34 = vrot.slane %v409_v32, 2  ;;  %v384_v41 = vrot.slane %v383_v36, 2 }
 0x14e   :  { %v398_v35 = vadd.f32 %v397_v33, %v396_v30 }
 0x14f   :  { %v411_v37 = vadd.f32 %v410_v34, %v409_v32  ;;  %v385_v45 = vadd.f32 %v384_v41, %v383_v36 }
 0x150   :  { %v399_v38 = vrot.slane %v398_v35, 1 }
 0x151   :  { %v412_v39 = vrot.slane %v411_v37, 1  ;;  %v386_v46 = vrot.slane %v385_v45, 1 }
 0x152   :  { %v400_v40 = vadd.f32 %v399_v38, %v398_v35 }
 0x153   :  { %v413_v42 = vadd.f32 %v412_v39, %v411_v37  ;;  %v387_v47 = vadd.f32 %v386_v46, %v385_v45 }
 0x154   :  { %v414_v43 = vmax.f32 %v400_v40, 1e-24 }
 0x155   :  { %v417_v44 = vmax.f32 %v413_v42, 1e-24 }
 0x156   :  { %584 = vrsqrt.f32 %v414_v43 }
 0x157   :  { %586 = vrsqrt.f32 %v417_v44 }
 0x160   :  { %v585_v48 = vpop.eup %584 }
 0x161   :  { %v416_v49 = vmul.f32 %v585_v48, %v387_v47  ;;  %v587_v50 = vpop.eup %586 }
 0x163   :  { %v419_v51 = vmul.f32 %v587_v50, %v416_v49 }
 0x165   :  { %420 = vst [vmem:[#allocation7] sm:$0x1] %v419_v51 }
 0x166   :  { %643 = shalt.err (!%p640_p6)
}
 0x167   :  { %s644_s17 = scalar_lea.hbm %s871_s3, 16 }
 0x168   :  { %p645_p7 = scmp.ne.s32.totalorder %s871_s3, %s644_s17  ;;  %p648_p8 = scmp.lt.u32.totalorder %s644_s17, %s871_s3 }
 0x16a   :  { %p650_p9 = pnand %p648_p8, %p645_p7 }
 0x16c   :  { %653 = shalt.err (!%p650_p9)
}
 0x16d   :  { %430 = dma.vmem_to_hbm [thread:$0]  %s428_s2, 16, %s871_s3, [#allocation4]  }
 0x16e   :  { %658 = dma.done.wait [#allocation4], 16  }
 0x16f   :  { %659 = vsyncadd [#allocation4], 4294967280 }
 0x170   :  { %434 = vsyncpa [#allocation3], 1 }
 0x171   :  { %435 = vsyncpa [#allocation6], 1 }
 0x172   :  { %436 = vsyncpa [#allocation4], 1 }

</bundles_post_ra>
